<compile_context>
chip_gen: v6e
topology: v6e:2x2x1
jax: 0.10.0
libtpu: 0.0.40
codegen_flags: <defaults>
</compile_context>

<pallas_src>
import jax
import jax.numpy as jnp
from jax.experimental import pallas as pl
from jax.experimental.pallas import tpu as pltpu


def _rotary_kernel(coord_ref, invf_ref, out_ref):
    # coord_ref: (1, TS, 1)   coordinates tile (scale factor already folded into invf)
    # invf_ref : (1, 1, D)    (scale/min_freq) * cat(inv_freq, inv_freq)
    # out_ref  : (1, TS, D)
    out_ref[...] = coord_ref[...] * invf_ref[...]


def _choose_block_s(S, out_dim, target_bytes=2 * 1024 * 1024):
    """Largest multiple-of-8 divisor of S whose output tile is <= ~target_bytes (else S)."""
    target_rows = max(8, target_bytes // (out_dim * 4))
    if S <= target_rows:
        return S
    ts = (min(S, target_rows) // 8) * 8
    while ts >= 8:
        if S % ts == 0:
            return ts
        ts -= 8
    return S  # fallback: take the whole sequence (always legal: block == full dim)


def rotary_embedding(coordinates, dim, *, min_freq=1.0 / 64, scale=1.0, block_s=None):
    """Pallas implementation of RotaryEmbedding.forward.

    coordinates: [B, S] array (any float/int dtype; cast to float32 like type_as).
    Returns [B, S, 2 * len(arange(0, dim, 2))] float32 (== [B, S, dim] for even dim).
    """
    coordinates = jnp.asarray(coordinates, dtype=jnp.float32)
    B, S = coordinates.shape
    half = (dim + 1) // 2            # len(arange(0, dim, 2))
    out_dim = 2 * half

    inv_freq = 1.0 / (10000.0 ** (jnp.arange(0, dim, 2, dtype=jnp.float32) / dim))
    scale_factor = jnp.float32(float(scale) / float(min_freq))
    # Fold the constant scale into the tiled frequency vector (trace-time constant).
    invf_full = (scale_factor * jnp.concatenate([inv_freq, inv_freq], axis=0)
                 ).reshape(1, 1, out_dim)

    if block_s is None:
        block_s = _choose_block_s(S, out_dim)
    assert S % block_s == 0 and (block_s == S or block_s % 8 == 0), (S, block_s)

    coords3 = coordinates.reshape(B, S, 1)   # put t on the sublane axis

    out = pl.pallas_call(
        _rotary_kernel,
        out_shape=jax.ShapeDtypeStruct((B, S, out_dim), jnp.float32),
        grid_spec=pltpu.PrefetchScalarGridSpec(
            num_scalar_prefetch=0,
            grid=(B, S // block_s),
            in_specs=[
                pl.BlockSpec((1, block_s, 1), lambda b, s: (b, s, 0)),   # coords tile
                pl.BlockSpec((1, 1, out_dim), lambda b, s: (0, 0, 0)),   # shared inv_freq
            ],
            out_specs=pl.BlockSpec((1, block_s, out_dim), lambda b, s: (b, s, 0)),
        ),
        compiler_params=pltpu.CompilerParams(
            dimension_semantics=("parallel", "parallel"),
        ),
    )(coords3, invf_full)
    return out


def _reference(coordinates, dim, *, min_freq=1.0 / 64, scale=1.0):
    """Pure-JAX reference mirroring the PyTorch forward exactly."""
    inv_freq = 1.0 / (10000.0 ** (jnp.arange(0, dim, 2, dtype=jnp.float32) / dim))
    t = jnp.asarray(coordinates, dtype=jnp.float32) * (scale / min_freq)
    freqs = jnp.einsum("...i,j->...ij", t, inv_freq)
    return jnp.concatenate([freqs, freqs], axis=-1)


if __name__ == "__main__":
    key = jax.random.PRNGKey(0)

    # --- small test matching the module's typical call: coords in [0, 1) ---
    B, S, DIM = 2, 8, 32
    coords = jax.random.uniform(key, (B, S), dtype=jnp.float32)
    out = jax.block_until_ready(rotary_embedding(coords, DIM, min_freq=1.0 / 64, scale=1.0))
    ref = _reference(coords, DIM, min_freq=1.0 / 64, scale=1.0)
    assert out.shape == (B, S, DIM), out.shape
    assert jnp.allclose(out, ref, atol=1e-5, rtol=1e-5), float(jnp.max(jnp.abs(out - ref)))

    # --- exercise the tiled-sequence path (multi-tile grid) ---
    key2 = jax.random.PRNGKey(0)
    B2, S2, DIM2 = 2, 1024, 128
    coords2 = jax.random.uniform(key2, (B2, S2), dtype=jnp.float32) * 100.0
    out2 = jax.block_until_ready(
        rotary_embedding(coords2, DIM2, min_freq=1.0 / 64, scale=1.0, block_s=256))
    ref2 = _reference(coords2, DIM2, min_freq=1.0 / 64, scale=1.0)
    assert out2.shape == (B2, S2, DIM2), out2.shape
    assert jnp.allclose(out2, ref2, atol=1e-3, rtol=1e-5), float(jnp.max(jnp.abs(out2 - ref2)))

    print("KERNEL_OK")
</pallas_src>

<mosaic_0001>
module attributes {stable_mosaic.version = 11 : i64} {
  func.func @_rotary_kernel(%arg0: i32, %arg1: i32, %arg2: memref<1x8x1xf32, #tpu.memory_space<vmem>>, %arg3: memref<1x1x32xf32, #tpu.memory_space<vmem>>, %arg4: memref<1x8x32xf32, #tpu.memory_space<vmem>>) attributes {dimension_semantics = [#tpu.dimension_semantics<parallel>, #tpu.dimension_semantics<parallel>], iteration_bounds = array<i64: 2, 1>, scalar_prefetch = 0 : i64, scratch_operands = 0 : i64, tpu.core_type = #tpu.core_type<tc>, window_params = [{transform_indices = @transform_0, window_bounds = array<i64: 1, 8, 1>}, {pipeline_mode = #tpu.pipeline_mode<synchronous>, transform_indices = @transform_1, window_bounds = array<i64: 1, 1, 32>}, {transform_indices = @transform_2, window_bounds = array<i64: 1, 8, 32>}]} {
    %c0 = arith.constant 0 : index
    %c0_0 = arith.constant 0 : index
    %c0_1 = arith.constant 0 : index
    %0 = vector.load %arg2[%c0, %c0_0, %c0_1] : memref<1x8x1xf32, #tpu.memory_space<vmem>>, vector<1x8x1xf32>
    %c0_2 = arith.constant 0 : index
    %c0_3 = arith.constant 0 : index
    %c0_4 = arith.constant 0 : index
    %1 = vector.load %arg3[%c0_2, %c0_3, %c0_4] : memref<1x1x32xf32, #tpu.memory_space<vmem>>, vector<1x1x32xf32>
    %2 = vector.broadcast %0 : vector<1x8x1xf32> to vector<1x8x32xf32>
    %3 = vector.broadcast %1 : vector<1x1x32xf32> to vector<1x8x32xf32>
    %4 = arith.mulf %2, %3 : vector<1x8x32xf32>
    %c0_5 = arith.constant 0 : index
    %c0_6 = arith.constant 0 : index
    %c0_7 = arith.constant 0 : index
    %5 = vector.load %arg4[%c0_5, %c0_6, %c0_7] : memref<1x8x32xf32, #tpu.memory_space<vmem>>, vector<1x8x32xf32>
    tpu.vector_store %arg4[%c0_5, %c0_6, %c0_7], %4 {strides = array<i32>} : memref<1x8x32xf32, #tpu.memory_space<vmem>>, vector<1x8x32xf32>,
    return
  }
  func.func @transform_0(%arg0: i32, %arg1: i32) -> (i32, i32, i32) {
    %c0_i32 = arith.constant 0 : i32
    %c0_i32_0 = arith.constant 0 : i32
    return %arg0, %arg1, %c0_i32 : i32, i32, i32
  }
  func.func @transform_1(%arg0: i32, %arg1: i32) -> (i32, i32, i32) {
    %c0_i32 = arith.constant 0 : i32
    %c0_i32_0 = arith.constant 0 : i32
    %c0_i32_1 = arith.constant 0 : i32
    %c0_i32_2 = arith.constant 0 : i32
    return %c0_i32, %c0_i32_0, %c0_i32_1 : i32, i32, i32
  }
  func.func @transform_2(%arg0: i32, %arg1: i32) -> (i32, i32, i32) {
    %c0_i32 = arith.constant 0 : i32
    %c0_i32_0 = arith.constant 0 : i32
    return %arg0, %arg1, %c0_i32 : i32, i32, i32
  }
}

</mosaic_0001>

<bundles_post_ra>
// kernel: tpu_custom_call.1
= control target key start
LH: loop header
LB: loop body
LE: loop exit
PB: predicated region body
PF: predicated region fallthrough
CT: control target
= control target key end

     0   :  { %7 = vsyncpa [#allocation3], 0  ;;  %s532_s0 = inlined_call_operand.vmem [shape: f32[2,8,1], index: 0, kind: input, shape index: {}]   ;;  %s533_s1 = inlined_call_operand.vmem [shape: f32[1,1,32], index: 1, kind: input, shape index: {}]   ;;  %s534_s2 = inlined_call_operand.hbm [shape: f32[2,8,32], index: 2, kind: output, shape index: {}]  }
   0x1   :  { %9 = vsyncpa [#allocation3 + $0x1], 0  ;;  %s430_s9 = smov 0   ;;  %s432_s10 = smov 0  }
   0x2   :  { %s434_s11 = smov 0   ;;  %s436_s12 = smov 0  }
   0x3   :  { %s438_s13 = smov 0   ;;  %s440_s14 = smov 0  }
   0x4 LB: > { %s266_s15 = sadd.s32 4294967295, %s411_s14   ;;  %s267_s16 = sadd.s32 4294967294, %s411_s14   ;;  %s411_s14 = sphi %s440_s14, %s15_s14   ;;  %s407_s13 = sphi %s438_s13, %s541_s13   ;;  %s403_s12 = sphi %s436_s12, %s540_s12   ;;  %s399_s11 = sphi %s434_s11, %s539_s11   ;;  %s395_s10 = sphi %s432_s10, %s538_s10   ;;  %s391_s9 = sphi %s430_s9, %s537_s9  }
   0x5   : > { %s27_s17 = sadd.s32 1, %s407_s13  ;;  %s85_s18 = sadd.s32 1, %s399_s11 }
   0x6   : > { %p29_p0 = scmp.ge.s32.totalorder %s27_s17, 2  ;;  %p95_p1 = scmp.ne.s32.totalorder %s399_s11, %s395_s10 }
   0x7   : > { %p96_p2 = scmp.eq.s32.totalorder %s266_s15, 1  ;;  %p101_p3 = scmp.ne.s32.totalorder %s395_s10, %s391_s9 }
   0x8   : > { %s543_s17 = smov (%p29_p0, %s27_s17), 0  ;;  %p102_p5 = scmp.eq.s32.totalorder %s267_s16, 1 }
   0x9   : > { %p470_p4 = por %p96_p2, %p95_p1  ;;  %s80_s20 = ssub.s32 %s407_s13, %s543_s17 }
   0xa   : > { %p270_p6 = scmp.ge.s32.totalorder %s411_s14, 1  ;;  %p83_p7 = scmp.eq.s32.totalorder %s80_s20, 0 }
   0xb   : > { %p477_p8 = por %p102_p5, %p101_p3  ;;  %p133_p9 = scmp.lt.s32.totalorder %s411_s14, 3 }
   0xc   : > { %s483_s22 = scalar_select %p83_p7, %s399_s11, %s85_s18  }
   0xd   : > { %p134_p10 = pnand %p270_p6, %p133_p9 }
   0xe   : > { %p157_p11 = scmp.lt.s32.totalorder (!%p134_p10), %s403_s12, 1  ;;  %s154_s28 = sand.u32 (!%p134_p10), 1, %s395_s10  }
   0xf   : > { %137 = sbr.rel (%p134_p10) target bundleno = 164 (0xa4), region = 28  ;;  %s271_s29 = sshll.u32 (!%p134_p10), %s154_s28, 3 }
  0x10   : > { %s275_s4 = sshll.u32 (!%p134_p10), %s403_s12, 7  ;;  %s156_s5 = scalar_lea.vmem (!%p134_p10), [#allocation2], %s271_s29 }
  0x11   : > { %s195_s6 = sshll.u32 (!%p134_p10), %s156_s5, 4  ;;  %s193_s15 = scalar_lea.hbm (!%p134_p10), %s534_s2, %s275_s4  ;;  %s196_s6 = int_to_ptr.vmem [resolvable:$true] %s195_s6 }
  0x12   : > { %s181_s16 = scalar_lea.sflag (!%p134_p10), [#allocation3], %s154_s28  ;;  %s335_s18 = scalar_lea.vmem (!%p134_p10), %s196_s6, 128 }
  0x13   : > { %p336_p12 = scmp.ne.s32.totalorder (!%p134_p10), %s196_s6, %s335_s18  ;;  %s414_s20 = smov (!%p134_p10), [#allocation2]  }
  0x14   : > { %v413_v0 = vmov 0   ;;  %s158_s23 = scalar_select %p157_p11, %s403_s12, 1  ;;  %v273_v2 = vld [vmem:[%s533_s1] ss:$0 sm:$0xff]  ;;  %vm178_vm0 = vcmask 261120  }
  0x15   : > { %334 = vset.pattern.permute.xlu0 %v413_v0  ;;  %p337_p13 = pnand %p336_p12, %p470_p4 }
  0x16   : > { %s272_s24 = sshll.u32 %s158_s23, 3  ;;  %s339_s23 = sshll.u32 %s414_s20, 4  ;;  %s340_s23 = int_to_ptr.vmem [resolvable:$false] %s339_s23 }
  0x17   : > { %s163_s27 = scalar_lea.vmem %s532_s0, %s272_s24  ;;  %p338_p0 = pneg %p337_p13 }
  0x18   : > { %v164_v1 = vld [vmem:[%s163_s27] sm:$0xff]  ;;  %s341_s12 = scalar_lea.vmem %s340_s23, 256  ;;  %p342_p1 = scmp.lt.s32.totalorder %s196_s6, %s340_s23 }
  0x19   : > { %168 = vperm.xlu0 %334, %v164_v1   ;;  %p343_p2 = scmp.lt.s32.totalorder %s341_s12, %s335_s18 }
  0x1b   : > { %p344_p3 = por %p343_p2, %p342_p1 }
  0x1d   : > { %p345_p5 = pnand %p344_p3, %p338_p0 }
  0x94   : > { %v169_v3 = vpop.permute.xlu0 %168 }
  0x95   : > { %v177_v4 = vmul.f32 %v273_v2, %v169_v3 }
  0x97   : > { %179 = vst.msk [vmem:[%s156_s5] sm:$0xff] %vm178_vm0, %v177_v4 }
  0x98   : > { %348 = shalt.err (!%p345_p5)
}
  0x99   : > { %s349_s24 = scalar_lea.hbm %s193_s15, 128  ;;  %s353_s27 = scalar_lea.hbm %s534_s2, 256 }
  0x9a   : > { %p350_p6 = scmp.ne.s32.totalorder %s193_s15, %s349_s24  ;;  %p354_p10 = scmp.lt.s32.totalorder %s193_s15, %s534_s2 }
  0x9b   : > { %p355_p11 = scmp.lt.s32.totalorder %s353_s27, %s349_s24 }
  0x9c   : > { %p351_p7 = pnand %p350_p6, %p470_p4 }
  0x9d   : > { %p356_p12 = por %p355_p11, %p354_p10 }
  0x9e   : > { %p352_p9 = pneg %p351_p7 }
  0xa0   : > { %p357_p13 = pnand %p356_p12, %p352_p9 }
  0xa2   : > { %360 = shalt.err (!%p357_p13)
}
  0xa3   : > { %278 = dma.vmem_to_hbm [thread:$0]  (%p470_p4), %s196_s6, 128, %s193_s15, %s181_s16  }
  0xa4 PF: > { %p284_p0 = scmp.ge.s32.totalorder %s411_s14, 2  ;;  %s207_s30 = sand.u32 1, %s391_s9  }
  0xa5   : > { %s208_s3 = scalar_lea.sflag [#allocation3], %s207_s30 }
  0xa6   : > { %p281_p1 = pnand %p284_p0, %p477_p8 }
  0xa8   : > { %p282_p2 = pneg %p281_p1 }
  0xaa   : > { %386 = dma.done.wait (%p282_p2), %s208_s3, 128  }
  0xab   : > { %388 = vsyncadd (%p282_p2), %s208_s3, 4294967168  ;;  %s15_s14 = sadd.s32 1, %s411_s14   ;;  %s537_s9 = smov %s395_s10 }
  0xac   : > { %p12_p3 = scmp.ge.s32.totalorder %s15_s14, 4   ;;  %s538_s10 = smov %s399_s11 }
  0xad   : > { %s539_s11 = smov %s483_s22  ;;  %s540_s12 = smov %s407_s13 }
  0xae   : > { %s541_s13 = smov %s543_s17  ;;  %14 = sbr.rel (!%p12_p3) target bundleno = 4 (0x4), region = 63 }
  0xb3   :  { %213 = vsyncpa [#allocation3], 1 }
  0xb4   :  { %215 = vsyncpa [#allocation3 + $0x1], 1 }

</bundles_post_ra>
